<compile_context>
chip_gen: v5e
topology: v5e:2x2
jax: 0.10.0
libtpu: 0.0.40
codegen_flags: <defaults>
</compile_context>

<pallas_src>
import functools

import jax
import jax.numpy as jnp
from jax.experimental import pallas as pl
from jax.experimental.pallas import tpu as pltpu

_LANES = 128


def _round_up(x, m):
    return ((x + m - 1) // m) * m


def _vmem_budget():
    """~60% of physical VMEM for tile selection, ~75% as the scoped limit."""
    cap = 64 * 1024 * 1024          # conservative fallback (v7x per-core VMEM)
    try:
        info = pltpu.get_tpu_info()
        cap = int(getattr(info, "vmem_capacity_bytes", cap))
    except Exception:
        pass
    return int(cap * 0.60), int(cap * 0.75)


def _choose_tiles(ns, nt, d, itemsize, vmem_budget, sub_mult):
    """Pick (TM, TN).  Preference order:
       1) whole target resident (TN = nt_pad): target DMA'd exactly once and reused
          across every source block;
       2) otherwise stream the target with TM as large as possible (TM is the only
          lever on total target HBM traffic), shrinking TN first."""
    nt_align = _round_up(nt, _LANES)
    tm_max = min(512, _round_up(ns, sub_mult))

    def est(tm_, tn_):
        bufs = 2 * (tm_ * d + tn_ * d) * itemsize     # double-buffered blocks
        temps = 7 * tm_ * tn_ * 4                     # live (TM,TN) f32 temporaries
        accs = 2 * tm_ * _LANES * 4                   # lane-partial accumulators
        small = 4 * (tm_ + tn_) * 4
        return bufs + temps + accs + small

    # 1) full target residency, shrinking TM if needed (residency always wins on
    #    total HBM traffic).
    tm, tn = tm_max, nt_align
    while est(tm, tn) > vmem_budget and tm > max(sub_mult, 64):
        tm = max(sub_mult, _round_up(tm // 2, sub_mult))
    if est(tm, tn) > vmem_budget:
        # 2) stream the target: keep TM large, shrink TN first, TM last.
        tm, tn = tm_max, min(512, nt_align)
        while est(tm, tn) > vmem_budget and tn > _LANES:
            tn = max(_LANES, _round_up(tn // 2, _LANES))
        while est(tm, tn) > vmem_budget and tm > sub_mult:
            tm = max(sub_mult, _round_up(tm // 2, sub_mult))

    # Keep >= 2 source blocks so the second TensorCore (v7x megacore, via the
    # "parallel" outer axis) gets work.  Only applied when the target is resident,
    # where splitting costs no extra HBM traffic; harmless on single-TC v5e/v6e.
    if tn == nt_align and ns > sub_mult:
        tm = min(tm, _round_up((ns + 1) // 2, sub_mult))
    return tm, tn


def _ccsa_kernel(src_ref, s2_ref, tgt_ref, t2_ref, ssec_ref, tsec_ref,
                 loss_s_ref, loss_c_ref, s_acc, c_acc,
                 *, margin, two_inv_d, inv_nt):
    j = pl.program_id(1)

    @pl.when(j == 0)
    def _init():
        s_acc[...] = jnp.zeros_like(s_acc)
        c_acc[...] = jnp.zeros_like(c_acc)

    s = src_ref[...]                                    # (TM, D)
    t = tgt_ref[...]                                    # (TN, D)

    # Pairwise mean-squared-difference via the Gram trick on the MXU; contract the
    # last dims of both operands (no in-kernel transpose of t).
    gram = jax.lax.dot_general(
        s, t, dimension_numbers=(((1,), (1,)), ((), ())),
        preferred_element_type=jnp.float32)             # (TM, TN)

    s2 = s2_ref[...]        # (TM, 1)  hoisted ||s||^2 / D
    t2 = t2_ref[...]        # (1, TN)  hoisted ||t||^2 / D, pads poisoned to 1e30

    msd = jnp.maximum(s2 + t2 - gram * two_inv_d, 0.0)  # clamp fp cancellation noise
    dist = jnp.sqrt(msd)                                 # EUP slot
    hinge = jnp.maximum(margin - dist, 0.0)              # exactly 0 on padded columns

    same = ssec_ref[...] == tsec_ref[...]                # (TM, TN) bool; pads never match

    s_term = jnp.where(same, msd, 0.0)
    c_term = jnp.where(same, 0.0, hinge * hinge)

    # Lane-partial accumulation: fold the TN/128 vreg columns with cheap VALU adds
    # (static, 128-aligned lane slices) and defer the single cross-lane (XLU) reduce
    # plus the 1/Nt scale to the last j step.
    tn = s_term.shape[1]
    s_part = s_term[:, :_LANES]
    c_part = c_term[:, :_LANES]
    for k in range(1, tn // _LANES):
        s_part = s_part + s_term[:, k * _LANES:(k + 1) * _LANES]
        c_part = c_part + c_term[:, k * _LANES:(k + 1) * _LANES]
    s_acc[...] += s_part
    c_acc[...] += c_part

    @pl.when(j == pl.num_programs(1) - 1)
    def _finalize():
        # (TM, 1) outputs: tiny absolute volume, masked stores are negligible here.
        loss_s_ref[...] = jnp.sum(s_acc[...], axis=-1, keepdims=True) * inv_nt
        loss_c_ref[...] = jnp.sum(c_acc[...], axis=-1, keepdims=True) * inv_nt


def ccsa_forward(src_emb, tgt_emb, src_sec, tgt_sec, margin=2.0,
                 tm=None, tn=None, stream_dtype=None):
    """Returns (loss_s, loss_c), each of shape (Ns,) float32 (PyTorch CCSA forward)."""
    ns, d = src_emb.shape
    nt, dt = tgt_emb.shape
    assert d == dt

    emb_dtype = (jnp.dtype(stream_dtype) if stream_dtype is not None
                 else jnp.dtype(src_emb.dtype))
    itemsize = emb_dtype.itemsize
    sub_mult = max(8, 32 // max(1, itemsize))   # 8 for f32, 16 for bf16, 32 for int8

    budget, vmem_limit = _vmem_budget()
    auto_tm, auto_tn = _choose_tiles(ns, nt, d, itemsize, budget, sub_mult)
    tm = auto_tm if tm is None else tm
    tn = auto_tn if tn is None else tn
    assert tm % sub_mult == 0 and tn % _LANES == 0, (tm, tn)

    ns_pad = _round_up(ns, tm)
    nt_pad = _round_up(nt, tn)

    inv_d = 1.0 / float(d)

    # Streamed embeddings (optionally narrowed, e.g. bf16 on v5e); the Gram matmul
    # still accumulates in f32.
    src = jnp.pad(src_emb.astype(emb_dtype), ((0, ns_pad - ns), (0, 0)))
    tgt = jnp.pad(tgt_emb.astype(emb_dtype), ((0, nt_pad - nt), (0, 0)))

    # Hoisted squared norms (pre-scaled by 1/D) computed once in plain XLA from the
    # full-precision inputs.  Padded target columns get a large *finite* sentinel so
    # sqrt(msd) >> margin and the hinge is exactly 0 there (no validity-mask input).
    src_f32 = src_emb.astype(jnp.float32)
    tgt_f32 = tgt_emb.astype(jnp.float32)
    s2 = jnp.pad(jnp.sum(src_f32 * src_f32, axis=-1) * inv_d,
                 (0, ns_pad - ns)).reshape(ns_pad, 1)
    t2 = jnp.pad(jnp.sum(tgt_f32 * tgt_f32, axis=-1) * inv_d,
                 (0, nt_pad - nt), constant_values=1e30).reshape(1, nt_pad)

    # Section ids; pad sentinels (-1 src / -2 tgt) never match anything real.
    ssec = jnp.pad(src_sec.astype(jnp.int32), (0, ns_pad - ns),
                   constant_values=-1).reshape(ns_pad, 1)
    tsec = jnp.pad(tgt_sec.astype(jnp.int32), (0, nt_pad - nt),
                   constant_values=-2).reshape(1, nt_pad)

    grid = (ns_pad // tm, nt_pad // tn)

    kernel = functools.partial(
        _ccsa_kernel,
        margin=float(margin),
        two_inv_d=2.0 * inv_d,
        inv_nt=1.0 / float(nt),
    )

    # Target traffic: fetched once when resident (grid[1] == 1, constant block
    # index across the whole grid), otherwise re-streamed once per source block.
    tgt_passes = 1 if grid[1] == 1 else grid[0]
    cost = pl.CostEstimate(
        flops=int(2 * ns_pad * nt_pad * d + 8 * ns_pad * nt_pad),
        transcendentals=int(ns_pad * nt_pad),
        bytes_accessed=int(ns_pad * (d * itemsize + 8)
                           + tgt_passes * nt_pad * (d * itemsize + 8)
                           + 2 * ns_pad * 4),
    )

    loss_s, loss_c = pl.pallas_call(
        kernel,
        out_shape=(
            jax.ShapeDtypeStruct((ns_pad, 1), jnp.float32),
            jax.ShapeDtypeStruct((ns_pad, 1), jnp.float32),
        ),
        grid=grid,
        in_specs=[
            pl.BlockSpec((tm, d), lambda i, j: (i, 0)),    # src rows
            pl.BlockSpec((tm, 1), lambda i, j: (i, 0)),    # ||s||^2 / D
            pl.BlockSpec((tn, d), lambda i, j: (j, 0)),    # tgt rows (resident if tn==nt_pad)
            pl.BlockSpec((1, tn), lambda i, j: (0, j)),    # ||t||^2 / D (+ pad sentinel)
            pl.BlockSpec((tm, 1), lambda i, j: (i, 0)),    # src sections
            pl.BlockSpec((1, tn), lambda i, j: (0, j)),    # tgt sections
        ],
        out_specs=(
            pl.BlockSpec((tm, 1), lambda i, j: (i, 0)),
            pl.BlockSpec((tm, 1), lambda i, j: (i, 0)),
        ),
        scratch_shapes=[
            pltpu.VMEM((tm, _LANES), jnp.float32),
            pltpu.VMEM((tm, _LANES), jnp.float32),
        ],
        compiler_params=pltpu.CompilerParams(
            dimension_semantics=("parallel", "arbitrary"),
            vmem_limit_bytes=vmem_limit,
        ),
        cost_estimate=cost,
    )(src, s2, tgt, t2, ssec, tsec)

    return loss_s[:ns, 0], loss_c[:ns, 0]


def _reference(src_emb, tgt_emb, src_sec, tgt_sec, margin=2.0):
    # Pure-JAX reference mirroring the PyTorch double loop (vectorized).
    diff = src_emb[:, None, :] - tgt_emb[None, :, :]
    msd = jnp.mean(diff * diff, axis=-1)
    dist = jnp.sqrt(msd)
    same = src_sec[:, None] == tgt_sec[None, :]
    nt = tgt_emb.shape[0]
    loss_s = jnp.sum(jnp.where(same, msd, 0.0), axis=-1) / nt
    loss_c = jnp.sum(jnp.where(same, 0.0, jnp.maximum(margin - dist, 0.0) ** 2),
                     axis=-1) / nt
    return loss_s, loss_c


if __name__ == "__main__":
    fwd = jax.jit(ccsa_forward, static_argnames=("margin", "tm", "tn", "stream_dtype"))

    # Test 1: small, single-tile case (Nt padded to 128 lanes internally).
    k1, k2, k3, k4 = jax.random.split(jax.random.PRNGKey(0), 4)
    Ns, Nt, D = 8, 8, 32
    src_emb = jax.random.normal(k1, (Ns, D), dtype=jnp.float32)
    tgt_emb = jax.random.normal(k2, (Nt, D), dtype=jnp.float32)
    src_sec = jax.random.randint(k3, (Ns,), 0, 3, dtype=jnp.int32)
    tgt_sec = jax.random.randint(k4, (Nt,), 0, 3, dtype=jnp.int32)

    loss_s, loss_c = fwd(src_emb, tgt_emb, src_sec, tgt_sec)
    jax.block_until_ready((loss_s, loss_c))
    ref_s, ref_c = _reference(src_emb, tgt_emb, src_sec, tgt_sec)
    assert jnp.allclose(loss_s, ref_s, atol=1e-4, rtol=1e-4), (loss_s, ref_s)
    assert jnp.allclose(loss_c, ref_c, atol=1e-4, rtol=1e-4), (loss_c, ref_c)

    # Test 2: forced small tiles -> exercises multi-step accumulation over the Nt
    # grid axis, the parallel Ns axis, and padded-column masking (Nt=200 -> 256).
    k5, k6, k7, k8 = jax.random.split(jax.random.PRNGKey(1), 4)
    Ns2, Nt2, D2 = 24, 200, 32
    src_emb2 = jax.random.normal(k5, (Ns2, D2), dtype=jnp.float32)
    tgt_emb2 = jax.random.normal(k6, (Nt2, D2), dtype=jnp.float32)
    src_sec2 = jax.random.randint(k7, (Ns2,), 0, 4, dtype=jnp.int32)
    tgt_sec2 = jax.random.randint(k8, (Ns2 * 0 + Nt2,), 0, 4, dtype=jnp.int32)

    loss_s2, loss_c2 = fwd(src_emb2, tgt_emb2, src_sec2, tgt_sec2, tm=8, tn=128)
    jax.block_until_ready((loss_s2, loss_c2))
    ref_s2, ref_c2 = _reference(src_emb2, tgt_emb2, src_sec2, tgt_sec2)
    assert jnp.allclose(loss_s2, ref_s2, atol=1e-4, rtol=1e-4), (loss_s2, ref_s2)
    assert jnp.allclose(loss_c2, ref_c2, atol=1e-4, rtol=1e-4), (loss_c2, ref_c2)

    # Test 3: automatic tiling -> full target residency + >=2 source blocks
    # (megacore split path) on a slightly larger problem.
    k9, k10, k11, k12 = jax.random.split(jax.random.PRNGKey(2), 4)
    Ns3, Nt3, D3 = 40, 96, 32
    src_emb3 = jax.random.normal(k9, (Ns3, D3), dtype=jnp.float32)
    tgt_emb3 = jax.random.normal(k10, (Nt3, D3), dtype=jnp.float32)
    src_sec3 = jax.random.randint(k11, (Ns3,), 0, 3, dtype=jnp.int32)
    tgt_sec3 = jax.random.randint(k12, (Nt3,), 0, 3, dtype=jnp.int32)

    loss_s3, loss_c3 = fwd(src_emb3, tgt_emb3, src_sec3, tgt_sec3)
    jax.block_until_ready((loss_s3, loss_c3))
    ref_s3, ref_c3 = _reference(src_emb3, tgt_emb3, src_sec3, tgt_sec3)
    assert jnp.allclose(loss_s3, ref_s3, atol=1e-4, rtol=1e-4), (loss_s3, ref_s3)
    assert jnp.allclose(loss_c3, ref_c3, atol=1e-4, rtol=1e-4), (loss_c3, ref_c3)

    print("KERNEL_OK")
</pallas_src>

<mosaic_0001>
module attributes {stable_mosaic.version = 11 : i64} {
  func.func @_ccsa_kernel(%arg0: i32, %arg1: i32, %arg2: memref<8x32xf32, #tpu.memory_space<vmem>>, %arg3: memref<8x1xf32, #tpu.memory_space<vmem>>, %arg4: memref<128x32xf32, #tpu.memory_space<vmem>>, %arg5: memref<1x128xf32, #tpu.memory_space<vmem>>, %arg6: memref<8x1xi32, #tpu.memory_space<vmem>>, %arg7: memref<1x128xi32, #tpu.memory_space<vmem>>, %arg8: memref<8x1xf32, #tpu.memory_space<vmem>>, %arg9: memref<8x1xf32, #tpu.memory_space<vmem>>, %arg10: memref<8x128xf32, #tpu.memory_space<vmem>>, %arg11: memref<8x128xf32, #tpu.memory_space<vmem>>) attributes {dimension_semantics = [#tpu.dimension_semantics<parallel>, #tpu.dimension_semantics<arbitrary>], iteration_bounds = array<i64: 1, 1>, scalar_prefetch = 0 : i64, scratch_operands = 2 : i64, tpu.core_type = #tpu.core_type<tc>, window_params = [{transform_indices = @transform_0, window_bounds = array<i64: 8, 32>}, {transform_indices = @transform_1, window_bounds = array<i64: 8, 1>}, {transform_indices = @transform_2, window_bounds = array<i64: 128, 32>}, {transform_indices = @transform_3, window_bounds = array<i64: 1, 128>}, {transform_indices = @transform_4, window_bounds = array<i64: 8, 1>}, {transform_indices = @transform_5, window_bounds = array<i64: 1, 128>}, {transform_indices = @transform_6, window_bounds = array<i64: 8, 1>}, {transform_indices = @transform_7, window_bounds = array<i64: 8, 1>}]} {
    %c0_i32 = arith.constant 0 : i32
    %0 = arith.cmpi eq, %arg1, %c0_i32 : i32
    %1 = arith.extui %0 : i1 to i32
    %c0_i32_0 = arith.constant 0 : i32
    %2 = arith.cmpi ne, %1, %c0_i32_0 : i32
    scf.if %2 {
      %cst_28 = arith.constant 0.000000e+00 : f32
      %40 = vector.broadcast %cst_28 : f32 to vector<8x128xf32>
      %c0_29 = arith.constant 0 : index
      %c0_30 = arith.constant 0 : index
      %41 = vector.load %arg10[%c0_29, %c0_30] : memref<8x128xf32, #tpu.memory_space<vmem>>, vector<8x128xf32>
      tpu.vector_store %arg10[%c0_29, %c0_30], %40 {strides = array<i32>} : memref<8x128xf32, #tpu.memory_space<vmem>>, vector<8x128xf32>,
      %cst_31 = arith.constant 0.000000e+00 : f32
      %42 = vector.broadcast %cst_31 : f32 to vector<8x128xf32>
      %c0_32 = arith.constant 0 : index
      %c0_33 = arith.constant 0 : index
      %43 = vector.load %arg11[%c0_32, %c0_33] : memref<8x128xf32, #tpu.memory_space<vmem>>, vector<8x128xf32>
      tpu.vector_store %arg11[%c0_32, %c0_33], %42 {strides = array<i32>} : memref<8x128xf32, #tpu.memory_space<vmem>>, vector<8x128xf32>,
    } else {
    }
    %c0 = arith.constant 0 : index
    %c0_1 = arith.constant 0 : index
    %3 = vector.load %arg2[%c0, %c0_1] : memref<8x32xf32, #tpu.memory_space<vmem>>, vector<8x32xf32>
    %c0_2 = arith.constant 0 : index
    %c0_3 = arith.constant 0 : index
    %4 = vector.load %arg4[%c0_2, %c0_3] : memref<128x32xf32, #tpu.memory_space<vmem>>, vector<128x32xf32>
    %cst = arith.constant dense<0.000000e+00> : vector<8x128xf32>
    %5 = tpu.matmul %3, %4, %cst {dimension_numbers = #tpu.dot_dimension_numbers<[1], [1], [0], [0], [0, 0, 1, 0], [], []>} : vector<8x32xf32>, vector<128x32xf32>, vector<8x128xf32> -> vector<8x128xf32>
    %c0_4 = arith.constant 0 : index
    %c0_5 = arith.constant 0 : index
    %6 = vector.load %arg3[%c0_4, %c0_5] : memref<8x1xf32, #tpu.memory_space<vmem>>, vector<8x1xf32>
    %c0_6 = arith.constant 0 : index
    %c0_7 = arith.constant 0 : index
    %7 = vector.load %arg5[%c0_6, %c0_7] : memref<1x128xf32, #tpu.memory_space<vmem>>, vector<1x128xf32>
    %8 = vector.broadcast %6 : vector<8x1xf32> to vector<8x128xf32>
    %9 = vector.broadcast %7 : vector<1x128xf32> to vector<8x128xf32>
    %10 = arith.addf %8, %9 : vector<8x128xf32>
    %cst_8 = arith.constant 6.250000e-02 : f32
    %11 = vector.broadcast %cst_8 : f32 to vector<8x128xf32>
    %12 = arith.mulf %5, %11 : vector<8x128xf32>
    %13 = arith.subf %10, %12 : vector<8x128xf32>
    %cst_9 = arith.constant 0.000000e+00 : f32
    %14 = vector.broadcast %cst_9 : f32 to vector<8x128xf32>
    %15 = arith.maximumf %13, %14 : vector<8x128xf32>
    %16 = math.sqrt %15 : vector<8x128xf32>
    %cst_10 = arith.constant 2.000000e+00 : f32
    %17 = vector.broadcast %cst_10 : f32 to vector<8x128xf32>
    %18 = arith.subf %17, %16 : vector<8x128xf32>
    %cst_11 = arith.constant 0.000000e+00 : f32
    %19 = vector.broadcast %cst_11 : f32 to vector<8x128xf32>
    %20 = arith.maximumf %18, %19 : vector<8x128xf32>
    %c0_12 = arith.constant 0 : index
    %c0_13 = arith.constant 0 : index
    %21 = vector.load %arg6[%c0_12, %c0_13] : memref<8x1xi32, #tpu.memory_space<vmem>>, vector<8x1xi32>
    %c0_14 = arith.constant 0 : index
    %c0_15 = arith.constant 0 : index
    %22 = vector.load %arg7[%c0_14, %c0_15] : memref<1x128xi32, #tpu.memory_space<vmem>>, vector<1x128xi32>
    %23 = vector.broadcast %21 : vector<8x1xi32> to vector<8x128xi32>
    %24 = vector.broadcast %22 : vector<1x128xi32> to vector<8x128xi32>
    %25 = arith.cmpi eq, %23, %24 : vector<8x128xi32>
    %cst_16 = arith.constant 0.000000e+00 : f32
    %26 = vector.broadcast %cst_16 : f32 to vector<8x128xf32>
    %27 = arith.select %25, %15, %26 : vector<8x128xi1>, vector<8x128xf32>
    %28 = arith.mulf %20, %20 : vector<8x128xf32>
    %cst_17 = arith.constant 0.000000e+00 : f32
    %29 = vector.broadcast %cst_17 : f32 to vector<8x128xf32>
    %30 = arith.select %25, %29, %28 : vector<8x128xi1>, vector<8x128xf32>
    %c0_18 = arith.constant 0 : index
    %c0_19 = arith.constant 0 : index
    %31 = vector.load %arg10[%c0_18, %c0_19] : memref<8x128xf32, #tpu.memory_space<vmem>>, vector<8x128xf32>
    %32 = arith.addf %31, %27 : vector<8x128xf32>
    %c0_20 = arith.constant 0 : index
    %c0_21 = arith.constant 0 : index
    %33 = vector.load %arg10[%c0_20, %c0_21] : memref<8x128xf32, #tpu.memory_space<vmem>>, vector<8x128xf32>
    tpu.vector_store %arg10[%c0_20, %c0_21], %32 {strides = array<i32>} : memref<8x128xf32, #tpu.memory_space<vmem>>, vector<8x128xf32>,
    %c0_22 = arith.constant 0 : index
    %c0_23 = arith.constant 0 : index
    %34 = vector.load %arg11[%c0_22, %c0_23] : memref<8x128xf32, #tpu.memory_space<vmem>>, vector<8x128xf32>
    %35 = arith.addf %34, %30 : vector<8x128xf32>
    %c0_24 = arith.constant 0 : index
    %c0_25 = arith.constant 0 : index
    %36 = vector.load %arg11[%c0_24, %c0_25] : memref<8x128xf32, #tpu.memory_space<vmem>>, vector<8x128xf32>
    tpu.vector_store %arg11[%c0_24, %c0_25], %35 {strides = array<i32>} : memref<8x128xf32, #tpu.memory_space<vmem>>, vector<8x128xf32>,
    %c0_i32_26 = arith.constant 0 : i32
    %37 = arith.cmpi eq, %arg1, %c0_i32_26 : i32
    %38 = arith.extui %37 : i1 to i32
    %c0_i32_27 = arith.constant 0 : i32
    %39 = arith.cmpi ne, %38, %c0_i32_27 : i32
    scf.if %39 {
      %c0_28 = arith.constant 0 : index
      %c0_29 = arith.constant 0 : index
      %40 = vector.load %arg10[%c0_28, %c0_29] : memref<8x128xf32, #tpu.memory_space<vmem>>, vector<8x128xf32>
      %cst_30 = arith.constant dense<0.000000e+00> : vector<8xf32>
      %41 = vector.multi_reduction <add>, %40, %cst_30 [1] : vector<8x128xf32> to vector<8xf32>
      %42 = vector.shape_cast %41 : vector<8xf32> to vector<8x1xf32>
      %cst_31 = arith.constant 1.250000e-01 : f32
      %43 = vector.broadcast %cst_31 : f32 to vector<8x1xf32>
      %44 = arith.mulf %42, %43 : vector<8x1xf32>
      %c0_32 = arith.constant 0 : index
      %c0_33 = arith.constant 0 : index
      %45 = vector.load %arg8[%c0_32, %c0_33] : memref<8x1xf32, #tpu.memory_space<vmem>>, vector<8x1xf32>
      tpu.vector_store %arg8[%c0_32, %c0_33], %44 {strides = array<i32>} : memref<8x1xf32, #tpu.memory_space<vmem>>, vector<8x1xf32>,
      %c0_34 = arith.constant 0 : index
      %c0_35 = arith.constant 0 : index
      %46 = vector.load %arg11[%c0_34, %c0_35] : memref<8x128xf32, #tpu.memory_space<vmem>>, vector<8x128xf32>
      %cst_36 = arith.constant dense<0.000000e+00> : vector<8xf32>
      %47 = vector.multi_reduction <add>, %46, %cst_36 [1] : vector<8x128xf32> to vector<8xf32>
      %48 = vector.shape_cast %47 : vector<8xf32> to vector<8x1xf32>
      %cst_37 = arith.constant 1.250000e-01 : f32
      %49 = vector.broadcast %cst_37 : f32 to vector<8x1xf32>
      %50 = arith.mulf %48, %49 : vector<8x1xf32>
      %c0_38 = arith.constant 0 : index
      %c0_39 = arith.constant 0 : index
      %51 = vector.load %arg9[%c0_38, %c0_39] : memref<8x1xf32, #tpu.memory_space<vmem>>, vector<8x1xf32>
      tpu.vector_store %arg9[%c0_38, %c0_39], %50 {strides = array<i32>} : memref<8x1xf32, #tpu.memory_space<vmem>>, vector<8x1xf32>,
    } else {
    }
    return
  }
  func.func @transform_0(%arg0: i32, %arg1: i32) -> (i32, i32) {
    %c0_i32 = arith.constant 0 : i32
    %c0_i32_0 = arith.constant 0 : i32
    return %arg0, %c0_i32 : i32, i32
  }
  func.func @transform_1(%arg0: i32, %arg1: i32) -> (i32, i32) {
    %c0_i32 = arith.constant 0 : i32
    %c0_i32_0 = arith.constant 0 : i32
    return %arg0, %c0_i32 : i32, i32
  }
  func.func @transform_2(%arg0: i32, %arg1: i32) -> (i32, i32) {
    %c0_i32 = arith.constant 0 : i32
    %c0_i32_0 = arith.constant 0 : i32
    return %arg1, %c0_i32 : i32, i32
  }
  func.func @transform_3(%arg0: i32, %arg1: i32) -> (i32, i32) {
    %c0_i32 = arith.constant 0 : i32
    %c0_i32_0 = arith.constant 0 : i32
    return %c0_i32, %arg1 : i32, i32
  }
  func.func @transform_4(%arg0: i32, %arg1: i32) -> (i32, i32) {
    %c0_i32 = arith.constant 0 : i32
    %c0_i32_0 = arith.constant 0 : i32
    return %arg0, %c0_i32 : i32, i32
  }
  func.func @transform_5(%arg0: i32, %arg1: i32) -> (i32, i32) {
    %c0_i32 = arith.constant 0 : i32
    %c0_i32_0 = arith.constant 0 : i32
    return %c0_i32, %arg1 : i32, i32
  }
  func.func @transform_6(%arg0: i32, %arg1: i32) -> (i32, i32) {
    %c0_i32 = arith.constant 0 : i32
    %c0_i32_0 = arith.constant 0 : i32
    return %arg0, %c0_i32 : i32, i32
  }
  func.func @transform_7(%arg0: i32, %arg1: i32) -> (i32, i32) {
    %c0_i32 = arith.constant 0 : i32
    %c0_i32_0 = arith.constant 0 : i32
    return %arg0, %c0_i32 : i32, i32
  }
}

</mosaic_0001>

<bundles_post_ra>
// kernel: ccsa_forward.1
= control target key start
LH: loop header
LB: loop body
LE: loop exit
PB: predicated region body
PF: predicated region fallthrough
CT: control target
= control target key end

     0   :  { %vm48_vm0 = vcmask 261120   ;;  %v209_v10 = vmov 0   ;;  %vm171_vm4 = vcmask 7168   ;;  %s338_s2 = inlined_call_operand.vmem [shape: f32[128,32], index: 2, kind: input, shape index: {}]   ;;  %s339_s3 = inlined_call_operand.vmem [shape: f32[1,128], index: 3, kind: input, shape index: {}]   ;;  %s340_s5 = inlined_call_operand.vmem [shape: s32[1,128], index: 5, kind: input, shape index: {}]   ;;  %s341_s1 = inlined_call_operand.vmem [shape: f32[8,1], index: 1, kind: input, shape index: {}]   ;;  %s342_s4 = inlined_call_operand.vmem [shape: s32[8,1], index: 4, kind: input, shape index: {}]   ;;  %s343_s0 = inlined_call_operand.vmem [shape: f32[8,32], index: 0, kind: input, shape index: {}]   ;;  %s344_s6 = inlined_call_operand.vmem [shape: f32[8,1], index: 6, kind: output, shape index: {0}]   ;;  %s345_s7 = inlined_call_operand.vmem [shape: f32[8,1], index: 7, kind: output, shape index: {1}]  }
   0x1   :  { %v47_v0 = vld [vmem:[%s338_s2 + $0x78] sm:$0xff]  ;;  %v46_v1 = vld [vmem:[%s338_s2 + $0x70] sm:$0xff]  ;;  %v45_v2 = vld [vmem:[%s338_s2 + $0x68] sm:$0xff]  ;;  %204 = vset.pattern.permute.xlu0 %v209_v10 }
   0x2   :  { %186 = vmatpush.xpose.msk.msra.mxu0 %vm48_vm0, %v47_v0  ;;  %v44_v3 = vld [vmem:[%s338_s2 + $0x60] sm:$0xff]  ;;  %v43_v4 = vld [vmem:[%s338_s2 + $0x58] sm:$0xff]  ;;  %v42_v5 = vld [vmem:[%s338_s2 + $0x50] sm:$0xff] }
   0x3   :  { %v41_v6 = vld [vmem:[%s338_s2 + $0x48] sm:$0xff]  ;;  %v40_v7 = vld [vmem:[%s338_s2 + $0x40] sm:$0xff]  ;;  %v39_v8 = vld [vmem:[%s338_s2 + $0x38] sm:$0xff] }
   0x4   :  { %v120_v9 = vld [vmem:[%s341_s1] sm:$0xff]  ;;  %v38_v11 = vld [vmem:[%s338_s2 + $0x30] sm:$0xff]  ;;  %v37_v12 = vld [vmem:[%s338_s2 + $0x28] sm:$0xff] }
   0x5   :  { %124 = vperm.xlu0 %204, %v120_v9   ;;  %v148_v13 = vld [vmem:[%s342_s4] sm:$0xff]  ;;  %v35_v15 = vld [vmem:[%s338_s2 + $0x18] sm:$0xff]  ;;  %v34_v16 = vld [vmem:[%s338_s2 + $0x10] sm:$0xff] }
   0x6   :  { %187 = vmatpush.xpose.msk.msra.mxu0 %vm48_vm0, %v46_v1  ;;  %v36_v14 = vld [vmem:[%s338_s2 + $0x20] sm:$0xff]  ;;  %v33_v17 = vld [vmem:[%s338_s2 + $0x8] sm:$0xff] }
   0x7   :  { %v32_v18 = vld [vmem:[%s338_s2] sm:$0xff] }
   0x8   :  { %v31_v19 = vld [vmem:[%s343_s0] sm:$0xff] }
   0x9   :  { %v205_v21 = vld [vmem:[%s339_s3] ss:$0 sm:$0xff] }
   0xa   :  { %188 = vmatpush.xpose.msk.msra.mxu0 %vm48_vm0, %v45_v2  ;;  %v206_v25 = vld [vmem:[%s340_s5] ss:$0 sm:$0xff] }
   0xd   :  { %151 = vperm.xlu0 %204, %v148_v13  }
   0xe   :  { %189 = vmatpush.xpose.msk.msra.mxu0 %vm48_vm0, %v44_v3 }
  0x12   :  { %190 = vmatpush.xpose.msk.msra.mxu0 %vm48_vm0, %v43_v4 }
  0x16   :  { %191 = vmatpush.xpose.msk.msra.mxu0 %vm48_vm0, %v42_v5 }
  0x1a   :  { %192 = vmatpush.xpose.msk.msra.mxu0 %vm48_vm0, %v41_v6 }
  0x1e   :  { %193 = vmatpush.xpose.msk.msra.mxu0 %vm48_vm0, %v40_v7 }
  0x22   :  { %194 = vmatpush.xpose.msk.msra.mxu0 %vm48_vm0, %v39_v8 }
  0x26   :  { %195 = vmatpush.xpose.msk.msra.mxu0 %vm48_vm0, %v38_v11 }
  0x2a   :  { %196 = vmatpush.xpose.msk.msra.mxu0 %vm48_vm0, %v37_v12 }
  0x2e   :  { %197 = vmatpush.xpose.msk.msra.mxu0 %vm48_vm0, %v36_v14 }
  0x32   :  { %198 = vmatpush.xpose.msk.msra.mxu0 %vm48_vm0, %v35_v15 }
  0x36   :  { %199 = vmatpush.xpose.msk.msra.mxu0 %vm48_vm0, %v34_v16 }
  0x3a   :  { %200 = vmatpush.xpose.msk.msra.mxu0 %vm48_vm0, %v33_v17 }
  0x3e   :  { %201 = vmatpush.xpose.msk.msra.mxu0 %vm48_vm0, %v32_v18 }
  0x41   :  { %202 = vmatmul.msk.f32.vlgmr.msra.gmra.mxu0 %vm48_vm0, %v31_v19 }
  0x77   :  { %v125_v20 = vpop.permute.xlu0 %124 }
  0x78   :  { %v130_v22 = vadd.f32 %v205_v21, %v125_v20 }
  0x7f   :  { %v152_v26 = vpop.permute.xlu0 %151 }
  0x80   :  { %vm154_vm1 = vcmp.eq.s32.totalorder %v152_v26, %v206_v25 }
  0xbe   :  { %v117_v23 = vpop.f32.mrf.mxu0 }
  0xbf   :  { %v131_v24 = vmul.f32 0.0625, %v117_v23 }
  0xc1   :  { %v132_v27 = vsub.f32 %v130_v22, %v131_v24 }
  0xc3   :  { %v133_v28 = vmax.f32 %v132_v27, 0.0 }
  0xc5   :  { %v155_v29 = vsel %vm154_vm1, %v133_v28, 0.0  ;;  %207 = vrsqrt.f32 %v133_v28  ;;  %vm141_vm2 = vcmp.eq.f32.partialorder %v133_v28, inf  ;;  %v144_v37 = vand.u32 2147483648, %v133_v28 }
  0xc6   :  { %168 = vadd.xlane.f32.xlu1 %v155_v29  ;;  %vm143_vm3 = vcmp.eq.f32.partialorder %v133_v28, 0.0 }
  0xcb   :  { %v208_v30 = vpop.eup %207 }
  0xcc   :  { %v135_v31 = vmul.f32 %v208_v30, %v133_v28 }
  0xce   :  { %v136_v32 = vmul.f32 %v208_v30, %v135_v31 }
  0xd0   :  { %v137_v33 = vmul.f32 0.5, %v136_v32 }
  0xd2   :  { %v138_v34 = vsub.f32 1.5, %v137_v33 }
  0xd4   :  { %v139_v35 = vmul.f32 %v208_v30, %v138_v34 }
  0xd6   :  { %v140_v36 = vmul.f32 %v139_v35, %v133_v28 }
  0xd8   :  { %v142_v38 = vsel %vm141_vm2, %v133_v28, %v140_v36 }
  0xd9   :  { %v145_v39 = vsel %vm143_vm3, %v144_v37, %v142_v38 }
  0xda   :  { %v146_v40 = vsub.f32 2.0, %v145_v39 }
  0xdc   :  { %v147_v41 = vmax.f32 %v146_v40, 0.0 }
  0xde   :  { %v156_v42 = vmul.f32 %v147_v41, %v147_v41 }
  0xe0   :  { %v157_v43 = vsel %vm154_vm1, 0.0, %v156_v42 }
  0xe1   :  { %174 = vadd.xlane.f32.xlu1 %v157_v43 }
 0x139   :  { %v169_v44 = vpop.xlane.xlu1 %168 }
 0x13a   :  { %v170_v45 = vmul.f32 0.125, %v169_v44 }
 0x13c   :  { %172 = vst.msk [vmem:[%s344_s6] sm:$0xff] %vm171_vm4, %v170_v45 }
 0x154   :  { %v175_v46 = vpop.xlane.xlu1 %174 }
 0x155   :  { %v176_v47 = vmul.f32 0.125, %v175_v46 }
 0x157   :  { %177 = vst.msk [vmem:[%s345_s7] sm:$0xff] %vm171_vm4, %v176_v47 }

</bundles_post_ra>
